<compile_context>
chip_gen: v5e
topology: v5e:2x2
jax: 0.10.0
libtpu: 0.0.40
codegen_flags: <defaults>
</compile_context>

<pallas_src>
import numpy as np
import jax
import jax.numpy as jnp
from jax.experimental import pallas as pl
from jax.experimental.pallas import tpu as pltpu


# ---------------------------------------------------------------------------
# librosa-compatible mel filterbank (Slaney mel scale, norm='slaney'),
# built deterministically in-script (no checkpoint / file loads).
# ---------------------------------------------------------------------------
def _hz_to_mel(f):
    f = np.asarray(f, dtype=np.float64)
    f_sp = 200.0 / 3.0
    mels = f / f_sp
    min_log_hz = 1000.0
    min_log_mel = min_log_hz / f_sp
    logstep = np.log(6.4) / 27.0
    return np.where(
        f >= min_log_hz,
        min_log_mel + np.log(np.maximum(f, 1e-10) / min_log_hz) / logstep,
        mels,
    )


def _mel_to_hz(m):
    m = np.asarray(m, dtype=np.float64)
    f_sp = 200.0 / 3.0
    freqs = f_sp * m
    min_log_hz = 1000.0
    min_log_mel = min_log_hz / f_sp
    logstep = np.log(6.4) / 27.0
    return np.where(
        m >= min_log_mel,
        min_log_hz * np.exp(logstep * (m - min_log_mel)),
        freqs,
    )


def librosa_mel_fn(sr, n_fft, n_mels, fmin, fmax):
    if fmax is None:
        fmax = sr / 2.0
    n_freq = n_fft // 2 + 1
    fftfreqs = np.linspace(0.0, sr / 2.0, n_freq)
    mel_pts = _mel_to_hz(np.linspace(_hz_to_mel(fmin), _hz_to_mel(fmax), n_mels + 2))
    fdiff = np.diff(mel_pts)
    ramps = mel_pts[:, None] - fftfreqs[None, :]
    weights = np.zeros((n_mels, n_freq), dtype=np.float64)
    for i in range(n_mels):
        lower = -ramps[i] / fdiff[i]
        upper = ramps[i + 2] / fdiff[i + 1]
        weights[i] = np.maximum(0.0, np.minimum(lower, upper))
    enorm = 2.0 / (mel_pts[2 : n_mels + 2] - mel_pts[:n_mels])
    weights *= enorm[:, None]
    return weights.astype(np.float32)


# ---------------------------------------------------------------------------
# Pallas kernel: fused [cos|sin] DFT matmul -> magnitude -> mel matmul -> log10(clamp)
# ---------------------------------------------------------------------------
def _audio2mel_kernel(frames_ref, basis_ref, melT_ref, out_ref):
    Fpad = melT_ref.shape[0]
    x = frames_ref[...]                                            # (TM, n_fft) bf16
    # Single MXU pass over the concatenated [cos | -sin] basis (bf16 in, f32 acc).
    y = jnp.dot(x, basis_ref[...], preferred_element_type=jnp.float32)  # (TM, 2*Fpad)
    real = y[:, :Fpad]                                             # free 256-lane slice
    imag = y[:, Fpad:]
    mag = jnp.sqrt(real * real + imag * imag)                      # |STFT|, f32
    mel = jnp.dot(mag, melT_ref[...], preferred_element_type=jnp.float32)  # (TM, MelPad)
    out_ref[...] = jnp.log10(jnp.maximum(mel, 1e-5))


class Audio2MelPallas:
    def __init__(self, n_fft=256, hop_length=64, win_length=256,
                 sampling_rate=8000, n_mel_channels=32, mel_fmin=0.0, mel_fmax=None):
        assert win_length == n_fft, "kernel assumes win_length == n_fft (as in the module defaults)"
        self.n_fft = n_fft
        self.hop_length = hop_length
        self.win_length = win_length
        self.n_mel_channels = n_mel_channels

        # torch.hann_window (periodic): 0.5 * (1 - cos(2*pi*n / N))
        n = np.arange(win_length, dtype=np.float64)
        window = 0.5 * (1.0 - np.cos(2.0 * np.pi * n / win_length))

        mel_basis = librosa_mel_fn(sampling_rate, n_fft, n_mel_channels, mel_fmin, mel_fmax)

        n_freq = n_fft // 2 + 1
        self.n_freq = n_freq
        Fpad = ((n_freq + 127) // 128) * 128          # lane-pad freq axis; padded cols are zero
        self.Fpad = Fpad
        MelPad = ((n_mel_channels + 127) // 128) * 128  # lane-dense output (>=128 lanes)
        self.MelPad = MelPad

        # Fold the analysis window into the DFT bases:
        #   real[t,k] = sum_n (w[n] x[t*hop+n]) cos(2*pi*k*n/N)
        #   imag[t,k] = -sum_n (w[n] x[t*hop+n]) sin(2*pi*k*n/N)
        nn = np.arange(n_fft, dtype=np.float64)[:, None]
        kk = np.arange(n_freq, dtype=np.float64)[None, :]
        ang = 2.0 * np.pi * nn * kk / n_fft
        cos_b = window[:, None] * np.cos(ang)
        sin_b = -window[:, None] * np.sin(ang)

        # Concatenated [cos | sin] basis, bf16 (MXU-native), freq axis padded to Fpad each.
        basis = np.zeros((n_fft, 2 * Fpad), np.float32)
        basis[:, :n_freq] = cos_b
        basis[:, Fpad:Fpad + n_freq] = sin_b
        # TODO(synk): pack real/imag into a single Fpad-wide basis (imag[0]=imag[N/2]=0)
        # and recombine with pltpu.roll to halve the DFT MXU FLOPs.

        # Transposed mel basis, zero-padded in both freq rows and mel columns.
        melT = np.zeros((Fpad, MelPad), np.float32)
        melT[:n_freq, :n_mel_channels] = mel_basis.T

        self.basis = jnp.asarray(basis, dtype=jnp.bfloat16)
        self.melT = jnp.asarray(melT)
        self.mel_basis = jnp.asarray(mel_basis)        # kept for reference checks
        self.window = jnp.asarray(window.astype(np.float32))

    def __call__(self, audio):
        # audio: (B, 1, T) float32  (same as PyTorch NCW input)
        B = audio.shape[0]
        p = (self.n_fft - self.hop_length) // 2
        x = jnp.pad(audio, ((0, 0), (0, 0), (p, p)), mode="reflect")[:, 0, :]   # (B, Lp)
        Lp = x.shape[-1]
        n_frames = 1 + (Lp - self.n_fft) // self.hop_length

        # Frame extraction (glue): (B, n_frames, n_fft)
        # TODO(synk): replace this wrapper-side gather with an in-kernel manual DMA of
        # contiguous audio spans (memory_space=pl.ANY) to avoid the 4x framed-HBM traffic.
        idx = (np.arange(n_frames)[:, None] * self.hop_length
               + np.arange(self.n_fft)[None, :])
        frames = x[:, idx].astype(jnp.bfloat16).reshape(B * n_frames, self.n_fft)
        N = B * n_frames

        # Row tile: target 256 (full MXU M width on v6e/v7x); on small inputs split into
        # at least 2 tiles, and keep an even number of grid steps so both v7x TCs work.
        TM = min(256, max(8, ((N + 15) // 16) * 8))
        n_tiles = (N + TM - 1) // TM
        if n_tiles > 1 and n_tiles % 2 == 1:
            n_tiles += 1
        N_pad = n_tiles * TM
        if N_pad != N:
            frames = jnp.pad(frames, ((0, N_pad - N), (0, 0)))   # zero rows, sliced away later

        out = pl.pallas_call(
            _audio2mel_kernel,
            out_shape=jax.ShapeDtypeStruct((N_pad, self.MelPad), jnp.float32),
            grid=(n_tiles,),
            in_specs=[
                pl.BlockSpec((TM, self.n_fft), lambda i: (i, 0)),
                pl.BlockSpec((self.n_fft, 2 * self.Fpad), lambda i: (0, 0)),
                pl.BlockSpec((self.Fpad, self.MelPad), lambda i: (0, 0)),
            ],
            out_specs=pl.BlockSpec((TM, self.MelPad), lambda i: (i, 0)),
            compiler_params=pltpu.CompilerParams(
                dimension_semantics=("parallel",)),
        )(frames, self.basis, self.melT)

        # (N_pad, MelPad) -> (B, n_mel, n_frames)  (PyTorch output layout)
        out = out[:N, : self.n_mel_channels]
        return out.reshape(B, n_frames, self.n_mel_channels).transpose(0, 2, 1)


def _reference(audio, mod: Audio2MelPallas):
    """Pure-JAX reference mirroring torch semantics (rfft-based, f32)."""
    B = audio.shape[0]
    p = (mod.n_fft - mod.hop_length) // 2
    x = jnp.pad(audio, ((0, 0), (0, 0), (p, p)), mode="reflect")[:, 0, :]
    Lp = x.shape[-1]
    n_frames = 1 + (Lp - mod.n_fft) // mod.hop_length
    idx = (np.arange(n_frames)[:, None] * mod.hop_length
           + np.arange(mod.n_fft)[None, :])
    frames = x[:, idx] * mod.window[None, None, :]          # (B, n_frames, n_fft)
    fft = jnp.fft.rfft(frames, n=mod.n_fft, axis=-1)        # (B, n_frames, n_freq)
    mag = jnp.abs(fft).transpose(0, 2, 1)                   # (B, n_freq, n_frames)
    mel = jnp.einsum("mf,bft->bmt", mod.mel_basis, mag)
    return jnp.log10(jnp.maximum(mel, 1e-5))


if __name__ == "__main__":
    key = jax.random.PRNGKey(0)
    B, T = 2, 1024
    audio = jax.random.normal(key, (B, 1, T), dtype=jnp.float32)

    mod = Audio2MelPallas(n_fft=256, hop_length=64, win_length=256,
                          sampling_rate=8000, n_mel_channels=32)

    out = mod(audio)
    out = jax.block_until_ready(out)

    ref = jax.block_until_ready(_reference(audio, mod))
    assert out.shape == ref.shape, (out.shape, ref.shape)
    assert np.isfinite(np.asarray(out)).all()
    err = np.max(np.abs(np.asarray(out) - np.asarray(ref)))
    assert err < 5e-2, err

    print("KERNEL_OK")
</pallas_src>

<mosaic_0001>
module attributes {stable_mosaic.version = 11 : i64} {
  func.func @_audio2mel_kernel(%arg0: i32, %arg1: memref<16x256xbf16, #tpu.memory_space<vmem>>, %arg2: memref<256x512xbf16, #tpu.memory_space<vmem>>, %arg3: memref<256x128xf32, #tpu.memory_space<vmem>>, %arg4: memref<16x128xf32, #tpu.memory_space<vmem>>) attributes {dimension_semantics = [#tpu.dimension_semantics<parallel>], iteration_bounds = array<i64: 2>, scalar_prefetch = 0 : i64, scratch_operands = 0 : i64, tpu.core_type = #tpu.core_type<tc>, window_params = [{transform_indices = @transform_0, window_bounds = array<i64: 16, 256>}, {pipeline_mode = #tpu.pipeline_mode<synchronous>, transform_indices = @transform_1, window_bounds = array<i64: 256, 512>}, {pipeline_mode = #tpu.pipeline_mode<synchronous>, transform_indices = @transform_2, window_bounds = array<i64: 256, 128>}, {transform_indices = @transform_3, window_bounds = array<i64: 16, 128>}]} {
    %c0 = arith.constant 0 : index
    %c0_0 = arith.constant 0 : index
    %0 = vector.load %arg1[%c0, %c0_0] : memref<16x256xbf16, #tpu.memory_space<vmem>>, vector<16x256xbf16>
    %c0_1 = arith.constant 0 : index
    %c0_2 = arith.constant 0 : index
    %1 = vector.load %arg2[%c0_1, %c0_2] : memref<256x512xbf16, #tpu.memory_space<vmem>>, vector<256x512xbf16>
    %cst = arith.constant dense<0.000000e+00> : vector<16x512xf32>
    %2 = tpu.matmul %0, %1, %cst {dimension_numbers = #tpu.dot_dimension_numbers<[1], [0], [0], [1], [0, 0, 1, 1], [], []>} : vector<16x256xbf16>, vector<256x512xbf16>, vector<16x512xf32> -> vector<16x512xf32>
    %3 = vector.extract_strided_slice %2 {offsets = [0, 0], sizes = [16, 256], strides = [1, 1]} : vector<16x512xf32> to vector<16x256xf32>
    %4 = vector.extract_strided_slice %2 {offsets = [0, 256], sizes = [16, 256], strides = [1, 1]} : vector<16x512xf32> to vector<16x256xf32>
    %5 = arith.mulf %3, %3 : vector<16x256xf32>
    %6 = arith.mulf %4, %4 : vector<16x256xf32>
    %7 = arith.addf %5, %6 : vector<16x256xf32>
    %8 = math.sqrt %7 : vector<16x256xf32>
    %c0_3 = arith.constant 0 : index
    %c0_4 = arith.constant 0 : index
    %9 = vector.load %arg3[%c0_3, %c0_4] : memref<256x128xf32, #tpu.memory_space<vmem>>, vector<256x128xf32>
    %cst_5 = arith.constant dense<0.000000e+00> : vector<16x128xf32>
    %10 = tpu.matmul %8, %9, %cst_5 {dimension_numbers = #tpu.dot_dimension_numbers<[1], [0], [0], [1], [0, 0, 1, 1], [], []>} : vector<16x256xf32>, vector<256x128xf32>, vector<16x128xf32> -> vector<16x128xf32>
    %cst_6 = arith.constant 9.99999974E-6 : f32
    %11 = vector.broadcast %cst_6 : f32 to vector<16x128xf32>
    %12 = arith.maximumf %10, %11 : vector<16x128xf32>
    %13 = math.log %12 : vector<16x128xf32>
    %cst_7 = arith.constant 0.434294492 : f32
    %14 = vector.broadcast %cst_7 : f32 to vector<16x128xf32>
    %15 = arith.mulf %13, %14 : vector<16x128xf32>
    %c0_8 = arith.constant 0 : index
    %c0_9 = arith.constant 0 : index
    %16 = vector.load %arg4[%c0_8, %c0_9] : memref<16x128xf32, #tpu.memory_space<vmem>>, vector<16x128xf32>
    tpu.vector_store %arg4[%c0_8, %c0_9], %15 {strides = array<i32>} : memref<16x128xf32, #tpu.memory_space<vmem>>, vector<16x128xf32>,
    return
  }
  func.func @transform_0(%arg0: i32) -> (i32, i32) {
    %c0_i32 = arith.constant 0 : i32
    %c0_i32_0 = arith.constant 0 : i32
    return %arg0, %c0_i32 : i32, i32
  }
  func.func @transform_1(%arg0: i32) -> (i32, i32) {
    %c0_i32 = arith.constant 0 : i32
    %c0_i32_0 = arith.constant 0 : i32
    %c0_i32_1 = arith.constant 0 : i32
    return %c0_i32, %c0_i32_0 : i32, i32
  }
  func.func @transform_2(%arg0: i32) -> (i32, i32) {
    %c0_i32 = arith.constant 0 : i32
    %c0_i32_0 = arith.constant 0 : i32
    %c0_i32_1 = arith.constant 0 : i32
    return %c0_i32, %c0_i32_0 : i32, i32
  }
  func.func @transform_3(%arg0: i32) -> (i32, i32) {
    %c0_i32 = arith.constant 0 : i32
    %c0_i32_0 = arith.constant 0 : i32
    return %arg0, %c0_i32 : i32, i32
  }
}

</mosaic_0001>

<bundles_post_ra>
// kernel: tpu_custom_call.1
= control target key start
LH: loop header
LB: loop body
LE: loop exit
PB: predicated region body
PF: predicated region fallthrough
CT: control target
= control target key end

     0   :  { %8 = vsyncpa [#allocation3], 0  ;;  %s1819_s0 = inlined_call_operand.hbm [shape: bf16[32,256], index: 0, kind: input, shape index: {}]   ;;  %s1820_s1 = inlined_call_operand.hbm [shape: bf16[256,512], index: 1, kind: input, shape index: {}]   ;;  %s1821_s2 = inlined_call_operand.hbm [shape: f32[256,128], index: 2, kind: input, shape index: {}]   ;;  %s1822_s3 = inlined_call_operand.hbm [shape: f32[32,128], index: 3, kind: output, shape index: {}]  }
   0x1   :  { %10 = vsyncpa [#allocation3 + $0x1], 0 }
   0x2   :  { %11 = vsyncpa [#allocation6], 0 }
   0x3   :  { %12 = vsyncpa [#allocation4], 0 }
   0x4   :  { %14 = vsyncpa [#allocation4 + $0x1], 0  ;;  %s1650_s12 = smov 0   ;;  %s1652_s13 = smov 0  }
   0x5   :  { %s1654_s14 = smov 0   ;;  %s1656_s15 = smov 0  }
   0x6 LB: > { %s1671_s16 = sadd.s32 4294967295, %s1620_s15   ;;  %s991_s17 = sadd.s32 4294967294, %s1620_s15   ;;  %s1620_s15 = sphi %s1656_s15, %s1832_s15   ;;  %s1616_s14 = sphi %s1654_s14, %s1831_s14   ;;  %s1612_s13 = sphi %s1652_s13, %s1830_s13   ;;  %s1608_s12 = sphi %s1650_s12, %s1829_s12  }
   0x7   : > { %p40_p0 = scmp.ne.s32.totalorder %s1612_s13, %s1608_s12  ;;  %p41_p1 = scmp.eq.s32.totalorder %s1671_s16, 0 }
   0x8   : > { %p106_p2 = scmp.eq.s32.totalorder %s1671_s16, 1  ;;  %p112_p3 = scmp.eq.s32.totalorder %s991_s17, 1 }
   0x9   : > { %p1680_p4 = por %p41_p1, %p40_p0  ;;  %p992_p5 = scmp.ge.s32.totalorder %s1620_s15, 1 }
   0xa   : > { %p1685_p6 = por %p112_p3, %p40_p0  ;;  %p119_p7 = scmp.lt.s32.totalorder %s1620_s15, 3 }
   0xb   : > { %s130_s22 = sshll.u32 %s1820_s1, 4  ;;  %s1622_s24 = smov [#allocation5]   ;;  %s131_s22 = int_to_ptr.hbm [resolvable:$true] %s130_s22 }
   0xc   : > { %p1693_p8 = pnand %p992_p5, %p119_p7  ;;  %s132_s25 = sshll.u32 %s1622_s24, 4  ;;  %s133_s25 = int_to_ptr.vmem [resolvable:$true] %s132_s25 }
   0xd   : > { %s144_s28 = sshll.u32 %s1821_s2, 4  ;;  %s1623_s29 = smov 256   ;;  %s145_s28 = int_to_ptr.hbm [resolvable:$true] %s144_s28 }
   0xe   : > { %p1387_p9 = pneg %p1693_p8  ;;  %s1624_s30 = smov 16  }
   0xf   : > { %s1625_s4 = smov [#allocation7]   ;;  %s1626_s6 = smov 128  }
  0x10   : > { %p1388_p10 = pnand %p1387_p9, %p41_p1  ;;  %s146_s5 = sshll.u32 %s1625_s4, 4  ;;  %s147_s5 = int_to_ptr.vmem [resolvable:$true] %s146_s5 }
  0x11   : > { %s1627_s7 = smov 8   ;;  %s1709_s8 = sadd.s32 1, %s1620_s15  }
  0x12   : > { %1390 = dma.hbm_to_vmem [thread:$0]  (!%p1388_p10), %s131_s22, 8192, %s133_s25, [#allocation6], %s1623_s29, %s1623_s29, %s1624_s30  }
  0x13   : > { %1393 = dma.hbm_to_vmem [thread:$0]  (!%p1388_p10), %s145_s28, 4096, %s147_s5, [#allocation6], %s1626_s6, %s1626_s6, %s1627_s7  }
  0x14   : > { %s24_s9 = ssub.s32 %s1620_s15, %s1709_s8  ;;  %s27_s10 = sadd.s32 1, %s1616_s14 }
  0x15   : > { %p25_p12 = scmp.eq.s32.totalorder %s24_s9, 0  ;;  %p34_p13 = scmp.ne.s32.totalorder %s1616_s14, %s1612_s13 }
  0x16   : > { %p35_p0 = scmp.eq.s32.totalorder %s1620_s15, 0  ;;  %p1404_p7 = scmp.lt.s32.totalorder %s1620_s15, 2 }
  0x17   : > { %s1718_s11 = scalar_select %p25_p12, %s1616_s14, %s27_s10  }
  0x18   : > { %p36_p3 = por %p35_p0, %p34_p13  ;;  %p1722_p5 = por %p106_p2, %p34_p13 }
  0x19   : > { %s160_s20 = sand.u32 1, %s1616_s14   ;;  %s1275_s22 = sshll.u32 %s1620_s15, 4 }
  0x1a   : > { %s996_s21 = sshll.u32 %s160_s20, 4  ;;  %s170_s26 = scalar_lea.hbm %s1819_s0, %s1275_s22 }
  0x1b   : > { %s164_s27 = scalar_lea.vmem [#allocation2], %s996_s21  ;;  %s171_s29 = sshll.u32 %s170_s26, 4  ;;  %s172_s29 = int_to_ptr.hbm [resolvable:$true] %s171_s29 }
  0x1c   : > { %s173_s28 = sshll.u32 %s164_s27, 4  ;;  %p1732_p9 = pnand %p1404_p7, %p36_p3  ;;  %s174_s28 = int_to_ptr.vmem [resolvable:$true] %s173_s28 }
  0x1d   : > { %s161_s4 = scalar_lea.sflag [#allocation3], %s160_s20  ;;  %s1520_s5 = sshra.s32 %s172_s29, 4  ;;  %s1521_s5 = int_to_ptr.hbm [resolvable:$true] %s1520_s5 }
  0x1e   : > { %s1522_s9 = scalar_lea.hbm %s1521_s5, 16  ;;  %p1524_p10 = pneg %p1732_p9 }
  0x1f   : > { %p1523_p2 = scmp.ne.s32.totalorder %s1521_s5, %s1522_s9  ;;  %s1527_s22 = scalar_lea.hbm %s1819_s0, 32 }
  0x20   : > { %p1528_p0 = scmp.lt.s32.totalorder %s1521_s5, %s1819_s0  ;;  %p1529_p3 = scmp.lt.s32.totalorder %s1527_s22, %s1522_s9 }
  0x21   : > { %p1525_p12 = pnand %p1524_p10, %p1523_p2 }
  0x22   : > { %p1530_p7 = por %p1529_p3, %p1528_p0 }
  0x23   : > { %p1526_p13 = pneg %p1525_p12 }
  0x25   : > { %p1531_p11 = pnand %p1530_p7, %p1526_p13 }
  0x27   : > { %1534 = shalt.err (!%p1531_p11)
}
  0x28   : > { %1397 = dma.hbm_to_vmem [thread:$0]  (!%p1732_p9), %s172_s29, 256, %s174_s28, %s161_s4, %s1626_s6, %s1626_s6, %s1627_s7  }
  0x29   : > { %185 = sbr.rel (%p1693_p8) target bundleno = 436 (0x1b4), region = 32  ;;  %s1752_s20 = sand.u32 (!%p1693_p8), 1, %s1612_s13  }
  0x2a   : > { %s1001_s26 = sshll.u32 (!%p1693_p8), %s1752_s20, 4  ;;  %s188_s27 = scalar_lea.sflag (!%p1693_p8), [#allocation3], %s1752_s20 }
  0x2b   : > { %s1758_s5 = scalar_lea.vmem (!%p1693_p8), [#allocation2], %s1001_s26 }
  0x2e   : > { %1595 = dma.done.wait (%p1680_p4), %s188_s27, 256  }
  0x2f   : > { %1597 = vsyncadd (%p1680_p4), %s188_s27, 4294967040 }
  0x30   : > { %1599 = dma.done.wait (%p41_p1), [#allocation6], 12288  }
  0x31   : > { %1601 = vsyncadd (%p41_p1), [#allocation6], 4294955008  ;;  %v1127_v0 = vld [vmem:[#allocation5 + $0xe0] sm:$0xf]  ;;  %v1308_v1 = vld [vmem:[#allocation5 + $0xec] sm:$0xf0] }
  0x32   : > { %v1255_v2 = vld [vmem:[#allocation5 + $0x1e0] sm:$0xf]  ;;  %v1128_v3 = vor.u32 %v1308_v1, %v1127_v0  ;;  %v1340_v4 = vld [vmem:[#allocation5 + $0x1ec] sm:$0xf0]  ;;  %v1306_v5 = vld [vmem:[#allocation5 + $0xe4] sm:$0xf] }
  0x33   : > { %v1129_v6 = vld [vmem:[#allocation5 + $0xf0] sm:$0xf0]  ;;  %v1256_v7 = vor.u32 %v1340_v4, %v1255_v2  ;;  %v1338_v9 = vld [vmem:[#allocation5 + $0x1e4] sm:$0xf]  ;;  %v1111_v11 = vld [vmem:[#allocation5 + $0xc0] sm:$0xf] }
  0x34   : > { %v1132_v8 = vor.u32 %v1306_v5, %v1129_v6  ;;  %v1257_v10 = vld [vmem:[#allocation5 + $0x1f0] sm:$0xf0]  ;;  %623 = vmatpush.bf16.msra.mxu0 %v1128_v3  ;;  %v1304_v13 = vld [vmem:[#allocation5 + $0xcc] sm:$0xf0]  ;;  %v1239_v14 = vld [vmem:[#allocation5 + $0x1c0] sm:$0xf] }
  0x35   : > { %v1260_v12 = vor.u32 %v1338_v9, %v1257_v10  ;;  %v1336_v15 = vld [vmem:[#allocation5 + $0x1cc] sm:$0xf0]  ;;  %637 = vmatpush.bf16.msra.mxu1 %v1256_v7  ;;  %v1112_v16 = vor.u32 %v1304_v13, %v1111_v11  ;;  %v1302_v18 = vld [vmem:[#allocation5 + $0xc4] sm:$0xf]  ;;  %v1113_v19 = vld [vmem:[#allocation5 + $0xd0] sm:$0xf0] }
  0x36   : > { %651 = vmatpush.bf16.msra.mxu2 %v1132_v8  ;;  %v1240_v17 = vor.u32 %v1336_v15, %v1239_v14  ;;  %v1334_v20 = vld [vmem:[#allocation5 + $0x1c4] sm:$0xf]  ;;  %v1116_v21 = vor.u32 %v1302_v18, %v1113_v19  ;;  %v1241_v22 = vld [vmem:[#allocation5 + $0x1d0] sm:$0xf0]  ;;  %v1095_v23 = vld [vmem:[#allocation5 + $0xa0] sm:$0xf] }
  0x37   : > { %665 = vmatpush.bf16.msra.mxu3 %v1260_v12  ;;  %v1300_v24 = vld [vmem:[#allocation5 + $0xac] sm:$0xf0]  ;;  %v1244_v25 = vor.u32 %v1334_v20, %v1241_v22  ;;  %v1223_v26 = vld [vmem:[#allocation5 + $0x1a0] sm:$0xf]  ;;  %v1298_v28 = vld [vmem:[#allocation5 + $0xa4] sm:$0xf] }
  0x38   : > { %v1332_v27 = vld [vmem:[#allocation5 + $0x1ac] sm:$0xf0]  ;;  %624 = vmatpush.bf16.msra.mxu0 %v1112_v16  ;;  %v1096_v29 = vor.u32 %v1300_v24, %v1095_v23  ;;  %v1097_v30 = vld [vmem:[#allocation5 + $0xb0] sm:$0xf0]  ;;  %v1330_v31 = vld [vmem:[#allocation5 + $0x1a4] sm:$0xf] }
  0x39   : > { %v1225_v32 = vld [vmem:[#allocation5 + $0x1b0] sm:$0xf0]  ;;  %638 = vmatpush.bf16.msra.mxu1 %v1240_v17  ;;  %v1224_v33 = vor.u32 %v1332_v27, %v1223_v26  ;;  %v1100_v34 = vor.u32 %v1298_v28, %v1097_v30  ;;  %v1079_v35 = vld [vmem:[#allocation5 + $0x80] sm:$0xf]  ;;  %v1296_v36 = vld [vmem:[#allocation5 + $0x8c] sm:$0xf0] }
  0x3a   : > { %652 = vmatpush.bf16.msra.mxu2 %v1116_v21  ;;  %v1207_v37 = vld [vmem:[#allocation5 + $0x180] sm:$0xf]  ;;  %v1228_v38 = vor.u32 %v1330_v31, %v1225_v32  ;;  %v1328_v39 = vld [vmem:[#allocation5 + $0x18c] sm:$0xf0]  ;;  %v1294_v40 = vld [vmem:[#allocation5 + $0x84] sm:$0xf]  ;;  %v1080_v44 = vor.u32 %v1296_v36, %v1079_v35 }
  0x3b   : > { %666 = vmatpush.bf16.msra.mxu3 %v1244_v25  ;;  %v1081_v41 = vld [vmem:[#allocation5 + $0x90] sm:$0xf0]  ;;  %v1326_v42 = vld [vmem:[#allocation5 + $0x184] sm:$0xf]  ;;  %v1208_v45 = vor.u32 %v1328_v39, %v1207_v37  ;;  %v1063_v47 = vld [vmem:[#allocation5 + $0x60] sm:$0xf] }
  0x3c   : > { %v1209_v43 = vld [vmem:[#allocation5 + $0x190] sm:$0xf0]  ;;  %625 = vmatpush.bf16.msra.mxu0 %v1096_v29  ;;  %v1084_v46 = vor.u32 %v1294_v40, %v1081_v41  ;;  %v1292_v48 = vld [vmem:[#allocation5 + $0x6c] sm:$0xf0]  ;;  %v1191_v49 = vld [vmem:[#allocation5 + $0x160] sm:$0xf] }
  0x3d   : > { %639 = vmatpush.bf16.msra.mxu1 %v1224_v33  ;;  %v1212_v50 = vor.u32 %v1326_v42, %v1209_v43  ;;  %v1324_v51 = vld [vmem:[#allocation5 + $0x16c] sm:$0xf0]  ;;  %v1290_v52 = vld [vmem:[#allocation5 + $0x64] sm:$0xf]  ;;  %v1065_v53 = vld [vmem:[#allocation5 + $0x70] sm:$0xf0]  ;;  %v1064_v56 = vor.u32 %v1292_v48, %v1063_v47 }
  0x3e   : > { %653 = vmatpush.bf16.msra.mxu2 %v1100_v34  ;;  %v1322_v54 = vld [vmem:[#allocation5 + $0x164] sm:$0xf]  ;;  %v1193_v55 = vld [vmem:[#allocation5 + $0x170] sm:$0xf0]  ;;  %v1192_v57 = vor.u32 %v1324_v51, %v1191_v49  ;;  %v1068_v58 = vor.u32 %v1290_v52, %v1065_v53  ;;  %v1047_v59 = vld [vmem:[#allocation5 + $0x40] sm:$0xf] }
  0x3f   : > { %667 = vmatpush.bf16.msra.mxu3 %v1228_v38  ;;  %v1288_v60 = vld [vmem:[#allocation5 + $0x4c] sm:$0xf0]  ;;  %v1175_v61 = vld [vmem:[#allocation5 + $0x140] sm:$0xf]  ;;  %v1196_v62 = vor.u32 %v1322_v54, %v1193_v55  ;;  %v1286_v0 = vld [vmem:[#allocation5 + $0x44] sm:$0xf] }
  0x40   : > { %626 = vmatpush.bf16.msra.mxu0 %v1080_v44  ;;  %v1320_v63 = vld [vmem:[#allocation5 + $0x14c] sm:$0xf0]  ;;  %v1049_v1 = vld [vmem:[#allocation5 + $0x50] sm:$0xf0]  ;;  %v1318_v2 = vld [vmem:[#allocation5 + $0x144] sm:$0xf]  ;;  %v1048_v4 = vor.u32 %v1288_v60, %v1047_v59 }
  0x41   : > { %640 = vmatpush.bf16.msra.mxu1 %v1208_v45  ;;  %v1177_v3 = vld [vmem:[#allocation5 + $0x150] sm:$0xf0]  ;;  %v1176_v5 = vor.u32 %v1320_v63, %v1175_v61  ;;  %v1052_v6 = vor.u32 %v1286_v0, %v1049_v1  ;;  %v1031_v7 = vld [vmem:[#allocation5 + $0x20] sm:$0xf]  ;;  %v1284_v8 = vld [vmem:[#allocation5 + $0x2c] sm:$0xf0] }
  0x42   : > { %654 = vmatpush.bf16.msra.mxu2 %v1084_v46  ;;  %v1159_v9 = vld [vmem:[#allocation5 + $0x120] sm:$0xf]  ;;  %v1180_v10 = vor.u32 %v1318_v2, %v1177_v3  ;;  %v1316_v11 = vld [vmem:[#allocation5 + $0x12c] sm:$0xf0]  ;;  %v1282_v12 = vld [vmem:[#allocation5 + $0x24] sm:$0xf]  ;;  %v1032_v16 = vor.u32 %v1284_v8, %v1031_v7 }
  0x43   : > { %668 = vmatpush.bf16.msra.mxu3 %v1212_v50  ;;  %v1033_v13 = vld [vmem:[#allocation5 + $0x30] sm:$0xf0]  ;;  %v1314_v14 = vld [vmem:[#allocation5 + $0x124] sm:$0xf]  ;;  %v1015_v17 = vld [vmem:[#allocation5] sm:$0xf]  ;;  %v1160_v20 = vor.u32 %v1316_v11, %v1159_v9 }
  0x44   : > { %627 = vmatpush.bf16.msra.mxu0 %v1064_v56  ;;  %v1161_v15 = vld [vmem:[#allocation5 + $0x130] sm:$0xf0]  ;;  %v1280_v18 = vld [vmem:[#allocation5 + $0xc] sm:$0xf0]  ;;  %v1143_v19 = vld [vmem:[#allocation5 + $0x100] sm:$0xf]  ;;  %v1036_v21 = vor.u32 %v1282_v12, %v1033_v13 }
  0x45   : > { %641 = vmatpush.bf16.msra.mxu1 %v1192_v57  ;;  %v1312_v22 = vld [vmem:[#allocation5 + $0x10c] sm:$0xf0]  ;;  %v1278_v23 = vld [vmem:[#allocation5 + $0x4] sm:$0xf]  ;;  %v1017_v24 = vld [vmem:[#allocation5 + $0x10] sm:$0xf0]  ;;  %v1164_v25 = vor.u32 %v1314_v14, %v1161_v15  ;;  %v1016_v32 = vor.u32 %v1280_v18, %v1015_v17 }
  0x46   : > { %655 = vmatpush.bf16.msra.mxu2 %v1068_v58  ;;  %v1310_v26 = vld [vmem:[#allocation5 + $0x104] sm:$0xf]  ;;  %v1145_v27 = vld [vmem:[#allocation5 + $0x110] sm:$0xf0]  ;;  %v1135_v28 = vld [vmem:[#allocation5 + $0xe8] sm:$0xf]  ;;  %v1144_v36 = vor.u32 %v1312_v22, %v1143_v19  ;;  %v1020_v37 = vor.u32 %v1278_v23, %v1017_v24 }
  0x47   : > { %669 = vmatpush.bf16.msra.mxu3 %v1196_v62  ;;  %v1309_v29 = vld [vmem:[#allocation5 + $0xf4] sm:$0xf0]  ;;  %v1263_v30 = vld [vmem:[#allocation5 + $0x1e8] sm:$0xf]  ;;  %v1307_v33 = vld [vmem:[#allocation5 + $0xec] sm:$0xf]  ;;  %v1148_v41 = vor.u32 %v1310_v26, %v1145_v27 }
  0x48   : > { %628 = vmatpush.bf16.msra.mxu0 %v1048_v4  ;;  %v1341_v31 = vld [vmem:[#allocation5 + $0x1f4] sm:$0xf0]  ;;  %v1137_v34 = vld [vmem:[#allocation5 + $0xf8] sm:$0xf0]  ;;  %v1339_v35 = vld [vmem:[#allocation5 + $0x1ec] sm:$0xf]  ;;  %v1136_v42 = vor.u32 %v1309_v29, %v1135_v28 }
  0x49   : > { %642 = vmatpush.bf16.msra.mxu1 %v1176_v5  ;;  %v1265_v38 = vld [vmem:[#allocation5 + $0x1f8] sm:$0xf0]  ;;  %v1007_v39 = vld [vmem:[%s1758_s5] sm:$0xf]  ;;  %v1277_v40 = vld [vmem:[%s1758_s5 + $0x4] sm:$0xf0]  ;;  %v1264_v45 = vor.u32 %v1341_v31, %v1263_v30  ;;  %v1140_v46 = vor.u32 %v1307_v33, %v1137_v34 }
  0x4a   : > { %656 = vmatpush.bf16.msra.mxu2 %v1052_v6  ;;  %v1276_v43 = vld [vmem:[%s1758_s5 + $0x4] sm:$0xf]  ;;  %v1009_v44 = vld [vmem:[%s1758_s5 + $0x8] sm:$0xf0]  ;;  %v1119_v47 = vld [vmem:[#allocation5 + $0xc8] sm:$0xf]  ;;  %v1268_v50 = vor.u32 %v1339_v35, %v1265_v38  ;;  %v1772_v54 = vor.u32 %v1277_v40, %v1007_v39 }
  0x4b   : > { %670 = vmatpush.bf16.msra.mxu3 %v1180_v10  ;;  %v1305_v48 = vld [vmem:[#allocation5 + $0xd4] sm:$0xf0]  ;;  %v1247_v49 = vld [vmem:[#allocation5 + $0x1c8] sm:$0xf]  ;;  %v1303_v52 = vld [vmem:[#allocation5 + $0xcc] sm:$0xf]  ;;  %v1774_v57 = vor.u32 %v1276_v43, %v1009_v44 }
  0x4c   : > { %629 = vmatpush.bf16.msra.mxu0 %v1032_v16  ;;  %v1337_v51 = vld [vmem:[#allocation5 + $0x1d4] sm:$0xf0]  ;;  %v1121_v53 = vld [vmem:[#allocation5 + $0xd8] sm:$0xf0]  ;;  %v1335_v55 = vld [vmem:[#allocation5 + $0x1cc] sm:$0xf]  ;;  %v1120_v58 = vor.u32 %v1305_v48, %v1119_v47 }
  0x4d   : > { %643 = vmatpush.bf16.msra.mxu1 %v1160_v20  ;;  %v1249_v56 = vld [vmem:[#allocation5 + $0x1d8] sm:$0xf0]  ;;  %v1248_v59 = vor.u32 %v1337_v51, %v1247_v49  ;;  %v1124_v60 = vor.u32 %v1303_v52, %v1121_v53  ;;  %v1103_v61 = vld [vmem:[#allocation5 + $0xa8] sm:$0xf]  ;;  %v1301_v62 = vld [vmem:[#allocation5 + $0xb4] sm:$0xf0] }
  0x4e   : > { %657 = vmatpush.bf16.msra.mxu2 %v1036_v21  ;;  %v1231_v63 = vld [vmem:[#allocation5 + $0x1a8] sm:$0xf]  ;;  %v1252_v0 = vor.u32 %v1335_v55, %v1249_v56  ;;  %v1333_v1 = vld [vmem:[#allocation5 + $0x1b4] sm:$0xf0]  ;;  %v1299_v2 = vld [vmem:[#allocation5 + $0xac] sm:$0xf]  ;;  %v1104_v6 = vor.u32 %v1301_v62, %v1103_v61 }
  0x4f   : > { %671 = vmatpush.bf16.msra.mxu3 %v1164_v25  ;;  %v1105_v3 = vld [vmem:[#allocation5 + $0xb8] sm:$0xf0]  ;;  %v1331_v4 = vld [vmem:[#allocation5 + $0x1ac] sm:$0xf]  ;;  %v1232_v7 = vor.u32 %v1333_v1, %v1231_v63  ;;  %v1087_v9 = vld [vmem:[#allocation5 + $0x88] sm:$0xf] }
  0x50   : > { %630 = vmatpush.bf16.msra.mxu0 %v1016_v32  ;;  %v1233_v5 = vld [vmem:[#allocation5 + $0x1b8] sm:$0xf0]  ;;  %v1108_v8 = vor.u32 %v1299_v2, %v1105_v3  ;;  %v1297_v10 = vld [vmem:[#allocation5 + $0x94] sm:$0xf0]  ;;  %v1215_v11 = vld [vmem:[#allocation5 + $0x188] sm:$0xf] }
  0x51   : > { %644 = vmatpush.bf16.msra.mxu1 %v1144_v36  ;;  %v1236_v12 = vor.u32 %v1331_v4, %v1233_v5  ;;  %v1329_v13 = vld [vmem:[#allocation5 + $0x194] sm:$0xf0]  ;;  %v1295_v14 = vld [vmem:[#allocation5 + $0x8c] sm:$0xf]  ;;  %v1089_v15 = vld [vmem:[#allocation5 + $0x98] sm:$0xf0]  ;;  %v1088_v18 = vor.u32 %v1297_v10, %v1087_v9 }
  0x52   : > { %658 = vmatpush.bf16.msra.mxu2 %v1020_v37  ;;  %v1327_v16 = vld [vmem:[#allocation5 + $0x18c] sm:$0xf]  ;;  %v1217_v17 = vld [vmem:[#allocation5 + $0x198] sm:$0xf0]  ;;  %v1216_v19 = vor.u32 %v1329_v13, %v1215_v11  ;;  %v1092_v20 = vor.u32 %v1295_v14, %v1089_v15  ;;  %v1071_v21 = vld [vmem:[#allocation5 + $0x68] sm:$0xf] }
  0x53   : > { %672 = vmatpush.bf16.msra.mxu3 %v1148_v41  ;;  %631 = vmatmul.bf16.vlgmr.msra.gmra.mxu0 %v1772_v54  ;;  %v1293_v22 = vld [vmem:[#allocation5 + $0x74] sm:$0xf0]  ;;  %v1199_v23 = vld [vmem:[#allocation5 + $0x168] sm:$0xf]  ;;  %v1220_v24 = vor.u32 %v1327_v16, %v1217_v17  ;;  %v1291_v26 = vld [vmem:[#allocation5 + $0x6c] sm:$0xf] }
  0x54   : > { %679 = vmatpush.bf16.msrb.mxu0 %v1136_v42  ;;  %645 = vmatmul.bf16.vlgmr.msra.gmra.mxu1 %v1774_v57  ;;  %v1325_v25 = vld [vmem:[#allocation5 + $0x174] sm:$0xf0]  ;;  %v1073_v27 = vld [vmem:[#allocation5 + $0x78] sm:$0xf0]  ;;  %v1323_v28 = vld [vmem:[#allocation5 + $0x16c] sm:$0xf]  ;;  %v1072_v30 = vor.u32 %v1293_v22, %v1071_v21 }
  0x55   : > { %693 = vmatpush.bf16.msrb.mxu1 %v1264_v45  ;;  %659 = vmatmul.bf16.vlgmr.msra.gmra.mxu2 %v1772_v54  ;;  %v1201_v29 = vld [vmem:[#allocation5 + $0x178] sm:$0xf0]  ;;  %v1200_v31 = vor.u32 %v1325_v25, %v1199_v23  ;;  %v1076_v32 = vor.u32 %v1291_v26, %v1073_v27  ;;  %v1055_v33 = vld [vmem:[#allocation5 + $0x48] sm:$0xf]  ;;  %v1289_v34 = vld [vmem:[#allocation5 + $0x54] sm:$0xf0] }
  0x56   : > { %707 = vmatpush.bf16.msrb.mxu2 %v1140_v46  ;;  %673 = vmatmul.bf16.vlgmr.msra.gmra.mxu3 %v1774_v57  ;;  %v1183_v35 = vld [vmem:[#allocation5 + $0x148] sm:$0xf]  ;;  %v1204_v36 = vor.u32 %v1323_v28, %v1201_v29  ;;  %v1321_v37 = vld [vmem:[#allocation5 + $0x154] sm:$0xf0]  ;;  %v1287_v38 = vld [vmem:[#allocation5 + $0x4c] sm:$0xf]  ;;  %v1056_v42 = vor.u32 %v1289_v34, %v1055_v33 }
  0x57   : > { %721 = vmatpush.bf16.msrb.mxu3 %v1268_v50  ;;  %v1057_v39 = vld [vmem:[#allocation5 + $0x58] sm:$0xf0]  ;;  %v1319_v40 = vld [vmem:[#allocation5 + $0x14c] sm:$0xf]  ;;  %v1184_v43 = vor.u32 %v1321_v37, %v1183_v35  ;;  %v1039_v45 = vld [vmem:[#allocation5 + $0x28] sm:$0xf] }
  0x58   : > { %680 = vmatpush.bf16.msrb.mxu0 %v1120_v58  ;;  %v1185_v41 = vld [vmem:[#allocation5 + $0x158] sm:$0xf0]  ;;  %v1060_v44 = vor.u32 %v1287_v38, %v1057_v39  ;;  %v1285_v46 = vld [vmem:[#allocation5 + $0x34] sm:$0xf0]  ;;  %v1167_v47 = vld [vmem:[#allocation5 + $0x128] sm:$0xf] }
  0x59   : > { %694 = vmatpush.bf16.msrb.mxu1 %v1248_v59  ;;  %v1188_v48 = vor.u32 %v1319_v40, %v1185_v41  ;;  %v1317_v49 = vld [vmem:[#allocation5 + $0x134] sm:$0xf0]  ;;  %v1283_v50 = vld [vmem:[#allocation5 + $0x2c] sm:$0xf]  ;;  %v1041_v51 = vld [vmem:[#allocation5 + $0x38] sm:$0xf0]  ;;  %v1040_v55 = vor.u32 %v1285_v46, %v1039_v45 }
  0x5a   : > { %708 = vmatpush.bf16.msrb.mxu2 %v1124_v60  ;;  %v1315_v52 = vld [vmem:[#allocation5 + $0x12c] sm:$0xf]  ;;  %v1169_v53 = vld [vmem:[#allocation5 + $0x138] sm:$0xf0]  ;;  %v1168_v56 = vor.u32 %v1317_v49, %v1167_v47  ;;  %v1044_v58 = vor.u32 %v1283_v50, %v1041_v51  ;;  %v1023_v59 = vld [vmem:[#allocation5 + $0x8] sm:$0xf] }
  0x5b   : > { %722 = vmatpush.bf16.msrb.mxu3 %v1252_v0  ;;  %v1281_v60 = vld [vmem:[#allocation5 + $0x14] sm:$0xf0]  ;;  %v1151_v61 = vld [vmem:[#allocation5 + $0x108] sm:$0xf]  ;;  %v1172_v62 = vor.u32 %v1315_v52, %v1169_v53  ;;  %v1279_v0 = vld [vmem:[#allocation5 + $0xc] sm:$0xf] }
  0x5c   : > { %681 = vmatpush.bf16.msrb.mxu0 %v1104_v6  ;;  %v1313_v63 = vld [vmem:[#allocation5 + $0x114] sm:$0xf0]  ;;  %v1025_v1 = vld [vmem:[#allocation5 + $0x18] sm:$0xf0]  ;;  %v1311_v2 = vld [vmem:[#allocation5 + $0x10c] sm:$0xf]  ;;  %v1024_v4 = vor.u32 %v1281_v60, %v1023_v59 }
  0x5d   : > { %695 = vmatpush.bf16.msrb.mxu1 %v1232_v7  ;;  %v1153_v3 = vld [vmem:[#allocation5 + $0x118] sm:$0xf0]  ;;  %v1152_v5 = vor.u32 %v1313_v63, %v1151_v61  ;;  %v1028_v6 = vor.u32 %v1279_v0, %v1025_v1  ;;  %v809_v9 = vld [vmem:[#allocation7 + $0x70] sm:$0xff]  ;;  %v808_v10 = vld [vmem:[#allocation7 + $0x68] sm:$0xff]  ;;  %s224_s18 = scalar_lea.vmem [#allocation8], %s1001_s26  ;;  %s1342_s23 = sshll.u32 %s1671_s16, 4 }
  0x5e   : > { %709 = vmatpush.bf16.msrb.mxu2 %v1108_v8  ;;  %v1156_v7 = vor.u32 %v1311_v2, %v1153_v3  ;;  %v810_v8 = vld [vmem:[#allocation7 + $0x78] sm:$0xff]  ;;  %v807_v11 = vld [vmem:[#allocation7 + $0x60] sm:$0xff]  ;;  %v825_v14 = vld [vmem:[#allocation7 + $0xf0] sm:$0xff]  ;;  %s895_s28 = scalar_lea.hbm %s1822_s3, %s1342_s23  ;;  %s896_s29 = sshll.u32 %s224_s18, 4  ;;  %s897_s29 = int_to_ptr.vmem [resolvable:$true] %s896_s29 }
  0x5f   : > { %723 = vmatpush.bf16.msrb.mxu3 %v1236_v12  ;;  %v826_v12 = vld [vmem:[#allocation7 + $0xf8] sm:$0xff]  ;;  %v804_v15 = vld [vmem:[#allocation7 + $0x48] sm:$0xff]  ;;  %v823_v16 = vld [vmem:[#allocation7 + $0xe0] sm:$0xff]  ;;  %s898_s30 = sshll.u32 %s895_s28, 4  ;;  %s884_s4 = scalar_lea.sflag [#allocation4], %s1752_s20  ;;  %s899_s30 = int_to_ptr.hbm [resolvable:$true] %s898_s30 }
  0x60   : > { %682 = vmatpush.bf16.msrb.mxu0 %v1088_v18  ;;  %v806_v13 = vld [vmem:[#allocation7 + $0x58] sm:$0xff]  ;;  %v803_v17 = vld [vmem:[#allocation7 + $0x40] sm:$0xff]  ;;  %v821_v21 = vld [vmem:[#allocation7 + $0xd0] sm:$0xff]  ;;  %s1564_s9 = sshra.s32 %s899_s30, 4  ;;  %s1570_s22 = scalar_lea.hbm %s1822_s3, 32  ;;  %s1565_s9 = int_to_ptr.hbm [resolvable:$true] %s1564_s9 }
  0x61   : > { %696 = vmatpush.bf16.msrb.mxu1 %v1216_v19  ;;  %v822_v18 = vld [vmem:[#allocation7 + $0xd8] sm:$0xff]  ;;  %v801_v23 = vld [vmem:[#allocation7 + $0x30] sm:$0xff]  ;;  %v800_v25 = vld [vmem:[#allocation7 + $0x28] sm:$0xff]  ;;  %s1566_s10 = scalar_lea.hbm %s1565_s9, 16  ;;  %p1571_p11 = scmp.lt.s32.totalorder %s1565_s9, %s1822_s3 }
  0x62   : > { %710 = vmatpush.bf16.msrb.mxu2 %v1092_v20  ;;  %v802_v20 = vld [vmem:[#allocation7 + $0x38] sm:$0xff]  ;;  %v819_v26 = vld [vmem:[#allocation7 + $0xc0] sm:$0xff]  ;;  %v797_v33 = vld [vmem:[#allocation7 + $0x10] sm:$0xff]  ;;  %p1567_p1 = scmp.ne.s32.totalorder %s1565_s9, %s1566_s10  ;;  %p1572_p9 = scmp.lt.s32.totalorder %s1570_s22, %s1566_s10 }
  0x63   : > { %724 = vmatpush.bf16.msrb.mxu3 %v1220_v24  ;;  %v820_v24 = vld [vmem:[#allocation7 + $0xc8] sm:$0xff]  ;;  %v799_v27 = vld [vmem:[#allocation7 + $0x20] sm:$0xff]  ;;  %v818_v28 = vld [vmem:[#allocation7 + $0xb8] sm:$0xff] }
  0x64   : > { %683 = vmatpush.bf16.msrb.mxu0 %v1072_v30  ;;  %v816_v34 = vld [vmem:[#allocation7 + $0xa8] sm:$0xff]  ;;  %v815_v37 = vld [vmem:[#allocation7 + $0xa0] sm:$0xff]  ;;  %v814_v40 = vld [vmem:[#allocation7 + $0x98] sm:$0xff]  ;;  %p1568_p4 = pnand %p1567_p1, %p1722_p5  ;;  %p1573_p2 = por %p1572_p9, %p1571_p11 }
  0x65   : > { %697 = vmatpush.bf16.msrb.mxu1 %v1200_v31  ;;  %v798_v31 = vld [vmem:[#allocation7 + $0x18] sm:$0xff]  ;;  %v795_v39 = vld [vmem:[#allocation7] sm:$0xff]  ;;  %v813_v41 = vld [vmem:[#allocation7 + $0x90] sm:$0xff] }
  0x66   : > { %711 = vmatpush.bf16.msrb.mxu2 %v1076_v32  ;;  %v817_v32 = vld [vmem:[#allocation7 + $0xb0] sm:$0xff]  ;;  %v811_v47 = vld [vmem:[#allocation7 + $0x80] sm:$0xff]  ;;  %p1569_p8 = pneg %p1568_p4 }
  0x67   : > { %725 = vmatpush.bf16.msrb.mxu3 %v1204_v36  ;;  %v796_v36 = vld [vmem:[#allocation7 + $0x8] sm:$0xff] }
  0x68   : > { %684 = vmatpush.bf16.msrb.mxu0 %v1056_v42  ;;  %v812_v42 = vld [vmem:[#allocation7 + $0x88] sm:$0xff]  ;;  %p1574_p10 = pnand %p1573_p2, %p1569_p8 }
  0x69   : > { %698 = vmatpush.bf16.msrb.mxu1 %v1184_v43 }
  0x6a   : > { %712 = vmatpush.bf16.msrb.mxu2 %v1060_v44 }
  0x6b   : > { %726 = vmatpush.bf16.msrb.mxu3 %v1188_v48 }
  0x6c   : > { %685 = vmatpush.bf16.msrb.mxu0 %v1040_v55 }
  0x6d   : > { %699 = vmatpush.bf16.msrb.mxu1 %v1168_v56 }
  0x6e   : > { %713 = vmatpush.bf16.msrb.mxu2 %v1044_v58 }
  0x6f   : > { %727 = vmatpush.bf16.msrb.mxu3 %v1172_v62 }
  0x70   : > { %686 = vmatpush.bf16.msrb.mxu0 %v1024_v4 }
  0x71   : > { %700 = vmatpush.bf16.msrb.mxu1 %v1152_v5 }
  0x72   : > { %714 = vmatpush.bf16.msrb.mxu2 %v1028_v6 }
  0x73   : > { %728 = vmatpush.bf16.msrb.mxu3 %v1156_v7  ;;  %687 = vmatmul.bf16.vlgmr.msrb.gmra.mxu0 %v1772_v54 }
  0x74   : > { %701 = vmatmul.bf16.vlgmr.msrb.gmra.mxu1 %v1774_v57  ;;  %827 = vmatpush.msra.mxu0 %v810_v8 }
  0x75   : > { %715 = vmatmul.bf16.vlgmr.msrb.gmra.mxu2 %v1772_v54  ;;  %850 = vmatpush.msra.mxu1 %v826_v12  ;;  %v805_v54 = vld [vmem:[#allocation7 + $0x50] sm:$0xff] }
  0x76   : > { %729 = vmatmul.bf16.vlgmr.msrb.gmra.mxu3 %v1774_v57  ;;  %1343 = vmatpush.msra.mxu2 %v810_v8  ;;  %v824_v57 = vld [vmem:[#allocation7 + $0xe8] sm:$0xff] }
  0x77   : > { %828 = vmatpush.msra.mxu0 %v809_v9  ;;  %1359 = vmatpush.msra.mxu3 %v826_v12 }
  0x78   : > { %1344 = vmatpush.msra.mxu2 %v809_v9  ;;  %851 = vmatpush.msra.mxu1 %v825_v14 }
  0x79   : > { %829 = vmatpush.msra.mxu0 %v808_v10  ;;  %1360 = vmatpush.msra.mxu3 %v825_v14 }
  0x7a   : > { %1345 = vmatpush.msra.mxu2 %v808_v10  ;;  %852 = vmatpush.msra.mxu1 %v824_v57 }
  0x7b   : > { %830 = vmatpush.msra.mxu0 %v807_v11  ;;  %1361 = vmatpush.msra.mxu3 %v824_v57 }
  0x7c   : > { %1346 = vmatpush.msra.mxu2 %v807_v11  ;;  %853 = vmatpush.msra.mxu1 %v823_v16 }
  0x7d   : > { %831 = vmatpush.msra.mxu0 %v806_v13  ;;  %1362 = vmatpush.msra.mxu3 %v823_v16 }
  0x7e   : > { %1347 = vmatpush.msra.mxu2 %v806_v13  ;;  %854 = vmatpush.msra.mxu1 %v822_v18 }
  0x7f   : > { %832 = vmatpush.msra.mxu0 %v805_v54  ;;  %1363 = vmatpush.msra.mxu3 %v822_v18 }
  0x80   : > { %1348 = vmatpush.msra.mxu2 %v805_v54  ;;  %855 = vmatpush.msra.mxu1 %v821_v21 }
  0x81   : > { %833 = vmatpush.msra.mxu0 %v804_v15  ;;  %1364 = vmatpush.msra.mxu3 %v821_v21 }
  0x82   : > { %1349 = vmatpush.msra.mxu2 %v804_v15  ;;  %856 = vmatpush.msra.mxu1 %v820_v24 }
  0x83   : > { %834 = vmatpush.msra.mxu0 %v803_v17  ;;  %1365 = vmatpush.msra.mxu3 %v820_v24 }
  0x84   : > { %1350 = vmatpush.msra.mxu2 %v803_v17  ;;  %857 = vmatpush.msra.mxu1 %v819_v26 }
  0x85   : > { %835 = vmatpush.msra.mxu0 %v802_v20  ;;  %1366 = vmatpush.msra.mxu3 %v819_v26 }
  0x86   : > { %1351 = vmatpush.msra.mxu2 %v802_v20  ;;  %858 = vmatpush.msra.mxu1 %v818_v28 }
  0x87   : > { %836 = vmatpush.msra.mxu0 %v801_v23  ;;  %1367 = vmatpush.msra.mxu3 %v818_v28 }
  0x88   : > { %1352 = vmatpush.msra.mxu2 %v801_v23  ;;  %859 = vmatpush.msra.mxu1 %v817_v32 }
  0x89   : > { %837 = vmatpush.msra.mxu0 %v800_v25  ;;  %1368 = vmatpush.msra.mxu3 %v817_v32 }
  0x8a   : > { %1353 = vmatpush.msra.mxu2 %v800_v25  ;;  %860 = vmatpush.msra.mxu1 %v816_v34 }
  0x8b   : > { %838 = vmatpush.msra.mxu0 %v799_v27  ;;  %1369 = vmatpush.msra.mxu3 %v816_v34 }
  0x8c   : > { %1354 = vmatpush.msra.mxu2 %v799_v27  ;;  %861 = vmatpush.msra.mxu1 %v815_v37 }
  0x8d   : > { %839 = vmatpush.msra.mxu0 %v798_v31  ;;  %1370 = vmatpush.msra.mxu3 %v815_v37 }
  0x8e   : > { %1355 = vmatpush.msra.mxu2 %v798_v31  ;;  %862 = vmatpush.msra.mxu1 %v814_v40 }
  0x8f   : > { %840 = vmatpush.msra.mxu0 %v797_v33  ;;  %1371 = vmatpush.msra.mxu3 %v814_v40 }
  0x90   : > { %1356 = vmatpush.msra.mxu2 %v797_v33  ;;  %863 = vmatpush.msra.mxu1 %v813_v41 }
  0x91   : > { %841 = vmatpush.msra.mxu0 %v796_v36  ;;  %1372 = vmatpush.msra.mxu3 %v813_v41 }
  0x92   : > { %1357 = vmatpush.msra.mxu2 %v796_v36  ;;  %864 = vmatpush.msra.mxu1 %v812_v42 }
  0x93   : > { %842 = vmatpush.msra.mxu0 %v795_v39  ;;  %1373 = vmatpush.msra.mxu3 %v812_v42 }
  0x94   : > { %1358 = vmatpush.msra.mxu2 %v795_v39  ;;  %865 = vmatpush.msra.mxu1 %v811_v47 }
  0x95   : > { %1374 = vmatpush.msra.mxu3 %v811_v47 }
  0xd0   : > { %v632_v19 = vpop.f32.mrf.mxu0 }
  0xd1   : > { %v646_v22 = vpop.f32.mrf.mxu1 }
  0xd2   : > { %v647_v44 = vadd.f32 %v646_v22, %v632_v19 }
  0xd4   : > { %v735_v50 = vmul.f32 %v647_v44, %v647_v44 }
  0xd8   : > { %v660_v29 = vpop.f32.mrf.mxu2  ;;  %v634_v35 = vpop.f32.mrf.mxu0 }
  0xd9   : > { %v674_v30 = vpop.f32.mrf.mxu3  ;;  %v648_v38 = vpop.f32.mrf.mxu1 }
  0xda   : > { %v675_v53 = vadd.f32 %v674_v30, %v660_v29  ;;  %v649_v56 = vadd.f32 %v648_v38, %v634_v35 }
  0xdc   : > { %v736_v63 = vmul.f32 %v675_v53, %v675_v53  ;;  %v737_v1 = vmul.f32 %v649_v56, %v649_v56 }
  0xe0   : > { %v662_v43 = vpop.f32.mrf.mxu2 }
  0xe1   : > { %v676_v45 = vpop.f32.mrf.mxu3 }
  0xe2   : > { %v677_v6 = vadd.f32 %v676_v45, %v662_v43 }
  0xe4   : > { %v738_v12 = vmul.f32 %v677_v6, %v677_v6 }
  0xf0   : > { %v688_v46 = vpop.f32.mrf.mxu0 }
  0xf1   : > { %v702_v48 = vpop.f32.mrf.mxu1 }
  0xf2   : > { %v703_v49 = vadd.f32 %v702_v48, %v688_v46 }
  0xf4   : > { %v739_v51 = vmul.f32 %v703_v49, %v703_v49 }
  0xf6   : > { %v743_v52 = vadd.f32 %v739_v51, %v735_v50 }
  0xf8   : > { %v716_v55 = vpop.f32.mrf.mxu2  ;;  %1448 = vrsqrt.f32 %v743_v52  ;;  %v690_v59 = vpop.f32.mrf.mxu0  ;;  %vm754_vm0 = vcmp.eq.f32.partialorder %v743_v52, inf  ;;  %v757_v23 = vand.u32 2147483648, %v743_v52  ;;  %vm756_vm1 = vcmp.eq.f32.partialorder %v743_v52, 0.0 }
  0xf9   : > { %v730_v58 = vpop.f32.mrf.mxu3  ;;  %v704_v61 = vpop.f32.mrf.mxu1 }
  0xfa   : > { %v731_v60 = vadd.f32 %v730_v58, %v716_v55  ;;  %v705_v62 = vadd.f32 %v704_v61, %v690_v59 }
  0xfc   : > { %v740_v0 = vmul.f32 %v731_v60, %v731_v60  ;;  %v741_v2 = vmul.f32 %v705_v62, %v705_v62 }
  0xfe   : > { %v744_v3 = vadd.f32 %v740_v0, %v736_v63  ;;  %v1449_v4 = vpop.eup %1448  ;;  %v745_v5 = vadd.f32 %v741_v2, %v737_v1 }
  0xff   : > { %v748_v8 = vmul.f32 %v1449_v4, %v743_v52 }
 0x100   : > { %1450 = vrsqrt.f32 %v744_v3  ;;  %v718_v7 = vpop.f32.mrf.mxu2  ;;  %vm766_vm2 = vcmp.eq.f32.partialorder %v744_v3, inf  ;;  %vm768_vm3 = vcmp.eq.f32.partialorder %v744_v3, 0.0  ;;  %v769_v36 = vand.u32 2147483648, %v744_v3 }
 0x101   : > { %1452 = vrsqrt.f32 %v745_v5  ;;  %v732_v9 = vpop.f32.mrf.mxu3  ;;  %v749_v11 = vmul.f32 %v1449_v4, %v748_v8  ;;  %vm778_vm4 = vcmp.eq.f32.partialorder %v745_v5, inf  ;;  %v781_v39 = vand.u32 2147483648, %v745_v5 }
 0x102   : > { %v733_v10 = vadd.f32 %v732_v9, %v718_v7  ;;  %vm780_vm5 = vcmp.eq.f32.partialorder %v745_v5, 0.0 }
 0x103   : > { %v750_v14 = vmul.f32 0.5, %v749_v11 }
 0x104   : > { %v742_v13 = vmul.f32 %v733_v10, %v733_v10 }
 0x105   : > { %v751_v15 = vsub.f32 1.5, %v750_v14 }
 0x106   : > { %v1451_v54 = vpop.eup %1450  ;;  %v746_v57 = vadd.f32 %v742_v13, %v738_v12 }
 0x107   : > { %v1453_v16 = vpop.eup %1452  ;;  %v760_v17 = vmul.f32 %v1451_v54, %v744_v3  ;;  %v752_v18 = vmul.f32 %v1449_v4, %v751_v15 }
 0x108   : > { %1454 = vrsqrt.f32 %v746_v57  ;;  %v772_v19 = vmul.f32 %v1453_v16, %v745_v5  ;;  %vm790_vm6 = vcmp.eq.f32.partialorder %v746_v57, inf  ;;  %v793_v47 = vand.u32 2147483648, %v746_v57 }
 0x109   : > { %v761_v20 = vmul.f32 %v1451_v54, %v760_v17  ;;  %v753_v21 = vmul.f32 %v752_v18, %v743_v52  ;;  %vm792_vm7 = vcmp.eq.f32.partialorder %v746_v57, 0.0 }
 0x10a   : > { %v773_v22 = vmul.f32 %v1453_v16, %v772_v19 }
 0x10b   : > { %v762_v24 = vmul.f32 0.5, %v761_v20  ;;  %v755_v25 = vsel %vm754_vm0, %v743_v52, %v753_v21 }
 0x10c   : > { %v774_v26 = vmul.f32 0.5, %v773_v22  ;;  %v758_v27 = vsel %vm756_vm1, %v757_v23, %v755_v25 }
 0x10d   : > { %v763_v28 = vsub.f32 1.5, %v762_v24  ;;  %843 = vmatmul.f32.vlgmr.msra.gmra.mxu0 %v758_v27 }
 0x10e   : > { %v1455_v29 = vpop.eup %1454  ;;  %v775_v30 = vsub.f32 1.5, %v774_v26 }
 0x10f   : > { %v764_v31 = vmul.f32 %v1451_v54, %v763_v28  ;;  %v784_v32 = vmul.f32 %v1455_v29, %v746_v57 }
 0x110   : > { %v776_v33 = vmul.f32 %v1453_v16, %v775_v30 }
 0x111   : > { %v765_v34 = vmul.f32 %v764_v31, %v744_v3  ;;  %v785_v35 = vmul.f32 %v1455_v29, %v784_v32 }
 0x112   : > { %v777_v37 = vmul.f32 %v776_v33, %v745_v5 }
 0x113   : > { %v767_v38 = vsel %vm766_vm2, %v744_v3, %v765_v34  ;;  %v786_v40 = vmul.f32 0.5, %v785_v35 }
 0x114   : > { %v770_v41 = vsel %vm768_vm3, %v769_v36, %v767_v38  ;;  %v779_v42 = vsel %vm778_vm4, %v745_v5, %v777_v37 }
 0x115   : > { %866 = vmatmul.f32.vlgmr.msra.gmra.mxu1 %v770_v41  ;;  %v782_v43 = vsel %vm780_vm5, %v781_v39, %v779_v42  ;;  %v787_v44 = vsub.f32 1.5, %v786_v40 }
 0x116   : > { %846 = vmatmul.f32.vlgmr.msra.gmra.mxu2 %v782_v43 }
 0x117   : > { %v788_v45 = vmul.f32 %v1455_v29, %v787_v44 }
 0x119   : > { %v789_v46 = vmul.f32 %v788_v45, %v746_v57 }
 0x11b   : > { %v791_v48 = vsel %vm790_vm6, %v746_v57, %v789_v46 }
 0x11c   : > { %v794_v49 = vsel %vm792_vm7, %v793_v47, %v791_v48 }
 0x11d   : > { %869 = vmatmul.f32.vlgmr.msra.gmra.mxu3 %v794_v49 }
 0x18a   : > { %v844_v50 = vpop.f32.mrf.mxu0 }
 0x192   : > { %v867_v51 = vpop.f32.mrf.mxu1 }
 0x193   : > { %v868_v52 = vadd.f32 %v867_v51, %v844_v50 }
 0x195   : > { %v873_v53 = vmax.f32 %v868_v52, 1e-05 }
 0x197   : > { %1456 = vlog2.f32 %v873_v53 }
 0x199   : > { %v847_v59 = vpop.f32.mrf.mxu2 }
 0x19d   : > { %v1457_v55 = vpop.eup %1456 }
 0x19e   : > { %v876_v56 = vmul.f32 0.6931472, %v1457_v55 }
 0x1a0   : > { %v879_v58 = vmul.f32 0.4342945, %v876_v56  ;;  %v870_v60 = vpop.f32.mrf.mxu3 }
 0x1a1   : > { %v871_v61 = vadd.f32 %v870_v60, %v847_v59 }
 0x1a2   : > { %881 = vst [vmem:[%s224_s18] sm:$0xff] %v879_v58 }
 0x1a3   : > { %v874_v62 = vmax.f32 %v871_v61, 1e-05 }
 0x1a5   : > { %1458 = vlog2.f32 %v874_v62 }
 0x1ab   : > { %v1459_v63 = vpop.eup %1458 }
 0x1ac   : > { %v878_v0 = vmul.f32 0.6931472, %v1459_v63 }
 0x1ae   : > { %v880_v1 = vmul.f32 0.4342945, %v878_v0 }
 0x1b0   : > { %882 = vst [vmem:[%s224_s18 + $0x8] sm:$0xff] %v880_v1 }
 0x1b1   : > { %1577 = shalt.err (!%p1574_p10)
}
 0x1b2   : > { %s1628_s20 = smov 128   ;;  %s1629_s26 = smov 8  }
 0x1b3   : > { %1385 = dma.vmem_to_hbm [thread:$0]  (%p1722_p5), %s897_s29, 256, %s899_s30, %s884_s4, %s1628_s20, %s1628_s20, %s1629_s26  }
 0x1b4 PF: > { %s913_s27 = sand.u32 1, %s1608_s12   ;;  %p1828_p12 = scmp.ge.s32.totalorder %s1620_s15, 2 }
 0x1b5   : > { %s914_s5 = scalar_lea.sflag [#allocation4], %s913_s27 }
 0x1b6   : > { %p1399_p13 = pnand %p1828_p12, %p1685_p6 }
 0x1b8   : > { %p1400_p0 = pneg %p1399_p13 }
 0x1ba   : > { %1603 = dma.done.wait (%p1400_p0), %s914_s5, 256  }
 0x1bb   : > { %1605 = vsyncadd (%p1400_p0), %s914_s5, 4294967040  ;;  %p17_p3 = scmp.ge.s32.totalorder %s1709_s8, 4   ;;  %s1829_s12 = smov %s1612_s13 }
 0x1bc   : > { %s1830_s13 = smov %s1616_s14  ;;  %s1831_s14 = smov %s1718_s11 }
 0x1bd   : > { %s1832_s15 = smov %s1709_s8  ;;  %19 = sbr.rel (!%p17_p3) target bundleno = 6 (0x6), region = 85 }
 0x1c2   :  { %920 = vsyncpa [#allocation3], 1 }
 0x1c3   :  { %922 = vsyncpa [#allocation3 + $0x1], 1 }
 0x1c4   :  { %923 = vsyncpa [#allocation6], 1 }
 0x1c5   :  { %924 = vsyncpa [#allocation4], 1 }
 0x1c6   :  { %926 = vsyncpa [#allocation4 + $0x1], 1 }

</bundles_post_ra>
